<compile_context>
chip_gen: v6e
topology: v6e:2x2x1
jax: 0.10.0
libtpu: 0.0.40
codegen_flags: <defaults>
</compile_context>

<pallas_src>
import math

import jax
import jax.numpy as jnp
from jax.experimental import pallas as pl
from jax.experimental.pallas import tpu as pltpu


def make_pe_table(d_model: int, max_len: int = 5000) -> jnp.ndarray:
    """Deterministic sinusoidal positional-encoding table (max_len, d_model), f32."""
    position = jnp.arange(0, max_len, dtype=jnp.float32)[:, None]            # (L, 1)
    div_term = jnp.exp(
        jnp.arange(0, d_model, 2, dtype=jnp.float32)
        * (-math.log(10000.0) / d_model)
    )                                                                         # (D/2,)
    pe = jnp.zeros((max_len, d_model), dtype=jnp.float32)
    pe = pe.at[:, 0::2].set(jnp.sin(position * div_term))
    pe = pe.at[:, 1::2].set(jnp.cos(position * div_term))
    return pe


def _pe_add_seq_kernel(x_ref, pe_ref, o_ref):
    # Long-sequence path: batch dim squeezed; x/pe/o are (ts, D) tiles.
    # Add happens in the promoted dtype (pe stays f32); cast only the output.
    o_ref[...] = (x_ref[...] + pe_ref[...]).astype(o_ref.dtype)


def _pe_add_batch_kernel(x_ref, pe_ref, o_ref):
    # Short-sequence path: x/o are (TB, S, D); pe is one resident (S, D) block.
    o_ref[...] = (x_ref[...] + pe_ref[...][None, :, :]).astype(o_ref.dtype)


def _sublane_quantum(itemsize: int) -> int:
    # Sub-32-bit dtypes pack along sublanes: f32 -> 8 rows, bf16 -> 16, int8 -> 32.
    return max(8, 32 // max(1, itemsize))


def _choose_seq_tile(S: int, D: int, itemsize: int, target_bytes: int) -> int:
    """Sequence-tile rows: multiple of the sublane quantum, ~<= target_bytes."""
    q = _sublane_quantum(itemsize)
    max_rows = max(q, (target_bytes // max(1, D * itemsize)) // q * q)
    ts = min(max_rows, max(q, (S // q) * q))
    ts -= ts % q
    ts = max(ts, q)
    if S % q == 0:
        # Prefer a divisor of S so there is no partial tail tile (not required).
        t = ts
        while t >= q and S % t != 0:
            t -= q
        if t >= q:
            ts = t
    return ts


def positional_encoding(
    x: jnp.ndarray,
    pe_table: jnp.ndarray,
    *,
    seq_tile_bytes: int = 2 << 20,
    short_path_bytes: int = 2 << 20,
) -> jnp.ndarray:
    """x: (B, S, D); returns x + pe_table[:S, :] broadcast over batch."""
    B, S, D = x.shape
    max_len, Dp = pe_table.shape
    assert Dp == D, "pe table d_model mismatch"
    assert S <= max_len, "sequence longer than max_len"

    itemsize = jnp.dtype(x.dtype).itemsize
    out_dtype = jnp.promote_types(x.dtype, pe_table.dtype)

    # Lane-dense output: pad the feature dim to a multiple of 128 if ragged.
    D_out = D
    D_pad = pl.cdiv(D, 128) * 128
    if D_pad != D:
        x = jnp.pad(x, ((0, 0), (0, 0), (0, D_pad - D)))
        pe_table = jnp.pad(pe_table[:S], ((0, 0), (0, D_pad - D)))
        D = D_pad

    slab_bytes = S * D * itemsize

    if slab_bytes <= short_path_bytes:
        # ---- Short-sequence path: batch-tiled, pe resident in VMEM. ----
        pe_s = pe_table[:S]                       # block == full dims -> always legal
        tb = max(1, min(B, short_path_bytes // max(1, slab_bytes)))
        out = pl.pallas_call(
            _pe_add_batch_kernel,
            out_shape=jax.ShapeDtypeStruct((B, S, D), out_dtype),
            grid=(pl.cdiv(B, tb),),
            in_specs=[
                pl.BlockSpec((tb, S, D), lambda i: (i, 0, 0)),
                pl.BlockSpec((S, D), lambda i: (0, 0)),      # constant -> fetched once
            ],
            out_specs=pl.BlockSpec((tb, S, D), lambda i: (i, 0, 0)),
            compiler_params=pltpu.CompilerParams(
                dimension_semantics=("parallel",),
            ),
        )(x, pe_s)
    else:
        # ---- Long-sequence path: sequence outer, batch inner. ----
        ts = _choose_seq_tile(S, D, itemsize, seq_tile_bytes)
        n_s = pl.cdiv(S, ts)
        out = pl.pallas_call(
            _pe_add_seq_kernel,
            out_shape=jax.ShapeDtypeStruct((B, S, D), out_dtype),
            grid=(n_s, B),
            in_specs=[
                # One (ts, D) sequence tile of one batch row; batch dim squeezed.
                pl.BlockSpec((None, ts, D), lambda s, b: (b, s, 0)),
                # pe block index depends only on the outer s axis -> its DMA is
                # skipped on all inner batch steps after the first.
                pl.BlockSpec((ts, D), lambda s, b: (s, 0)),
            ],
            out_specs=pl.BlockSpec((None, ts, D), lambda s, b: (b, s, 0)),
            compiler_params=pltpu.CompilerParams(
                dimension_semantics=("parallel", "parallel"),
            ),
        )(x, pe_table)

    if D_out != D:
        out = out[..., :D_out]
    return out


if __name__ == "__main__":
    MAX_LEN = 5000
    key = jax.random.PRNGKey(0)
    k1, k2, k3 = jax.random.split(key, 3)

    # Demo shape consistent with the module: batch=2, seq=8, d_model=128.
    B, S, D = 2, 8, 128
    pe_table = make_pe_table(D, MAX_LEN)
    x = jax.random.normal(k1, (B, S, D), dtype=jnp.float32)

    out = jax.block_until_ready(positional_encoding(x, pe_table))
    ref = x + pe_table[None, :S, :]
    assert out.shape == (B, S, D)
    assert jnp.allclose(out, ref, atol=1e-6), "short-path mismatch vs reference"

    # Exercise the long-sequence (sequence-outer / batch-inner) path, including
    # a partial tail tile (S=20 is not a multiple of the 8-row tile).
    S2 = 20
    x2 = jax.random.normal(k2, (B, S2, D), dtype=jnp.float32)
    out2 = jax.block_until_ready(
        positional_encoding(x2, pe_table, seq_tile_bytes=4096, short_path_bytes=0)
    )
    ref2 = x2 + pe_table[None, :S2, :]
    assert out2.shape == (B, S2, D)
    assert jnp.allclose(out2, ref2, atol=1e-6), "long-path mismatch vs reference"

    # Exercise the ragged-D (lane-padding) path.
    D3 = 96
    pe96 = make_pe_table(D3, MAX_LEN)
    x3 = jax.random.normal(k3, (B, S, D3), dtype=jnp.float32)
    out3 = jax.block_until_ready(positional_encoding(x3, pe96))
    ref3 = x3 + pe96[None, :S, :]
    assert out3.shape == (B, S, D3)
    assert jnp.allclose(out3, ref3, atol=1e-6), "padded-D mismatch vs reference"

    print("KERNEL_OK")
</pallas_src>

<mosaic_0001>
module attributes {stable_mosaic.version = 11 : i64} {
  func.func @_pe_add_batch_kernel(%arg0: i32, %arg1: memref<2x8x128xf32, #tpu.memory_space<vmem>>, %arg2: memref<8x128xf32, #tpu.memory_space<vmem>>, %arg3: memref<2x8x128xf32, #tpu.memory_space<vmem>>) attributes {dimension_semantics = [#tpu.dimension_semantics<parallel>], iteration_bounds = array<i64: 1>, scalar_prefetch = 0 : i64, scratch_operands = 0 : i64, tpu.core_type = #tpu.core_type<tc>, window_params = [{transform_indices = @transform_0, window_bounds = array<i64: 2, 8, 128>}, {pipeline_mode = #tpu.pipeline_mode<synchronous>, transform_indices = @transform_1, window_bounds = array<i64: 8, 128>}, {transform_indices = @transform_2, window_bounds = array<i64: 2, 8, 128>}]} {
    %c0 = arith.constant 0 : index
    %c0_0 = arith.constant 0 : index
    %c0_1 = arith.constant 0 : index
    %0 = vector.load %arg1[%c0, %c0_0, %c0_1] : memref<2x8x128xf32, #tpu.memory_space<vmem>>, vector<2x8x128xf32>
    %c0_2 = arith.constant 0 : index
    %c0_3 = arith.constant 0 : index
    %1 = vector.load %arg2[%c0_2, %c0_3] : memref<8x128xf32, #tpu.memory_space<vmem>>, vector<8x128xf32>
    %2 = vector.shape_cast %1 : vector<8x128xf32> to vector<1x8x128xf32>
    %3 = vector.broadcast %2 : vector<1x8x128xf32> to vector<2x8x128xf32>
    %4 = arith.addf %0, %3 : vector<2x8x128xf32>
    %c0_4 = arith.constant 0 : index
    %c0_5 = arith.constant 0 : index
    %c0_6 = arith.constant 0 : index
    %5 = vector.load %arg3[%c0_4, %c0_5, %c0_6] : memref<2x8x128xf32, #tpu.memory_space<vmem>>, vector<2x8x128xf32>
    tpu.vector_store %arg3[%c0_4, %c0_5, %c0_6], %4 {strides = array<i32>} : memref<2x8x128xf32, #tpu.memory_space<vmem>>, vector<2x8x128xf32>,
    return
  }
  func.func @transform_0(%arg0: i32) -> (i32, i32, i32) {
    %c0_i32 = arith.constant 0 : i32
    %c0_i32_0 = arith.constant 0 : i32
    %c0_i32_1 = arith.constant 0 : i32
    return %arg0, %c0_i32, %c0_i32_0 : i32, i32, i32
  }
  func.func @transform_1(%arg0: i32) -> (i32, i32) {
    %c0_i32 = arith.constant 0 : i32
    %c0_i32_0 = arith.constant 0 : i32
    %c0_i32_1 = arith.constant 0 : i32
    return %c0_i32, %c0_i32_0 : i32, i32
  }
  func.func @transform_2(%arg0: i32) -> (i32, i32, i32) {
    %c0_i32 = arith.constant 0 : i32
    %c0_i32_0 = arith.constant 0 : i32
    %c0_i32_1 = arith.constant 0 : i32
    return %arg0, %c0_i32, %c0_i32_0 : i32, i32, i32
  }
}

</mosaic_0001>

<bundles_post_ra>
// kernel: tpu_custom_call.1
= control target key start
LH: loop header
LB: loop body
LE: loop exit
PB: predicated region body
PF: predicated region fallthrough
CT: control target
= control target key end

     0   :  { %7 = vsyncpa [#allocation3], 0  ;;  %s169_s0 = inlined_call_operand.hbm [shape: f32[2,8,128], index: 0, kind: input, shape index: {}]   ;;  %s170_s1 = inlined_call_operand.hbm [shape: f32[8,128], index: 1, kind: input, shape index: {}]   ;;  %s171_s2 = inlined_call_operand.hbm [shape: f32[2,8,128], index: 2, kind: output, shape index: {}]  }
   0x1   :  { %8 = vsyncpa [#allocation6], 0 }
   0x2   :  { %9 = vsyncpa [#allocation4], 0  ;;  %s134_s9 = smov [#allocation2]  }
   0x3   :  { %s15_s10 = sshll.u32 %s134_s9, 4  ;;  %s16_s10 = int_to_ptr.vmem [resolvable:$true] %s15_s10 }
   0x4   :  { %s76_s11 = scalar_lea.vmem %s16_s10, 256  ;;  %p81_p1 = scmp.lt.s32.totalorder %s16_s10, %s16_s10 }
   0x5   :  { %p77_p0 = scmp.ne.s32.totalorder %s16_s10, %s76_s11  ;;  %p82_p2 = scmp.lt.s32.totalorder %s76_s11, %s76_s11 }
   0x7   :  { %p83_p3 = por %p82_p2, %p81_p1 }
   0x9   :  { %p84_p4 = pnand %p83_p3, %p77_p0 }
   0xb   :  { %87 = shalt.err (!%p84_p4)
}
   0xc   :  { %s135_s12 = smov 128   ;;  %s136_s13 = smov 8  }
   0xd   :  { %21 = dma.hbm_to_vmem [thread:$0]  %s169_s0, 256, %s16_s10, [#allocation3], %s135_s12, %s135_s12, %s136_s13  }
   0xe   :  { %s137_s16 = smov [#allocation5]  }
   0xf   :  { %s28_s17 = sshll.u32 %s137_s16, 4  ;;  %s29_s17 = int_to_ptr.vmem [resolvable:$true] %s28_s17 }
  0x10   :  { %s96_s18 = scalar_lea.vmem %s29_s17, 128  ;;  %p101_p6 = scmp.lt.s32.totalorder %s29_s17, %s29_s17 }
  0x11   :  { %p97_p5 = scmp.ne.s32.totalorder %s29_s17, %s96_s18  ;;  %p102_p7 = scmp.lt.s32.totalorder %s96_s18, %s96_s18 }
  0x13   :  { %p103_p8 = por %p102_p7, %p101_p6 }
  0x15   :  { %p104_p9 = pnand %p103_p8, %p97_p5 }
  0x17   :  { %107 = shalt.err (!%p104_p9)
}
  0x18   :  { %31 = dma.hbm_to_vmem [thread:$0]  %s170_s1, 128, %s29_s17, [#allocation6]  }
  0x19   :  { %128 = dma.done.wait [#allocation3], 256  }
  0x1a   :  { %129 = vsyncadd [#allocation3], 4294967040 }
  0x1b   :  { %130 = dma.done.wait [#allocation6], 128  }
  0x1c   :  { %131 = vsyncadd [#allocation6], 4294967168  ;;  %s138_s21 = smov [#allocation7]   ;;  %v38_v0 = vld [vmem:[#allocation2] sm:$0xff]  ;;  %v40_v1 = vld [vmem:[#allocation5] sm:$0xff] }
  0x1d   :  { %s50_s0 = sshll.u32 %s138_s21, 4  ;;  %v39_v2 = vld [vmem:[#allocation2 + $0x8] sm:$0xff]  ;;  %v41_v3 = vadd.f32 %v40_v1, %v38_v0  ;;  %s51_s0 = int_to_ptr.vmem [resolvable:$true] %s50_s0 }
  0x1e   :  { %v42_v4 = vadd.f32 %v40_v1, %v39_v2  ;;  %s108_s22 = scalar_lea.vmem %s51_s0, 256  ;;  %p113_p11 = scmp.lt.s32.totalorder %s51_s0, %s51_s0 }
  0x1f   :  { %43 = vst [vmem:[#allocation7] sm:$0xff] %v41_v3  ;;  %p109_p10 = scmp.ne.s32.totalorder %s51_s0, %s108_s22  ;;  %p114_p12 = scmp.lt.s32.totalorder %s108_s22, %s108_s22 }
  0x20   :  { %44 = vst [vmem:[#allocation7 + $0x8] sm:$0xff] %v42_v4 }
  0x21   :  { %p115_p13 = por %p114_p12, %p113_p11 }
  0x23   :  { %p116_p0 = pnand %p115_p13, %p109_p10 }
  0x25   :  { %119 = shalt.err (!%p116_p0)
}
  0x26   :  { %56 = dma.vmem_to_hbm [thread:$0]  %s51_s0, 256, %s171_s2, [#allocation4], %s135_s12, %s135_s12, %s136_s13  }
  0x27   :  { %132 = dma.done.wait [#allocation4], 256  }
  0x28   :  { %133 = vsyncadd [#allocation4], 4294967040 }
  0x29   :  { %60 = vsyncpa [#allocation3], 1 }
  0x2a   :  { %61 = vsyncpa [#allocation6], 1 }
  0x2b   :  { %62 = vsyncpa [#allocation4], 1 }

</bundles_post_ra>
